<compile_context>
chip_gen: v6e
topology: v6e:2x2x1
jax: 0.10.0
libtpu: 0.0.40
codegen_flags: <defaults>
</compile_context>

<pallas_src>
import jax
import jax.numpy as jnp
from jax.experimental import pallas as pl
from jax.experimental.pallas import tpu as pltpu


# --------------------------------------------------------------------------
# helpers
# --------------------------------------------------------------------------
def _round_up(x, m):
    return (x + m - 1) // m * m


def _pad_axis(x, axis, new_size):
    pad = [(0, 0)] * x.ndim
    pad[axis] = (0, new_size - x.shape[axis])
    return jnp.pad(x, pad)


def _pad_gates(w, H, Hp):
    """Pad the last dim (4*H, PyTorch gate order i,f,g,o) gate-wise to 4*Hp."""
    lead = w.shape[:-1]
    w4 = w.reshape(lead + (4, H))
    w4 = _pad_axis(w4, -1, Hp)
    return w4.reshape(lead + (4 * Hp,))


def _pick_tile(dim, target, quantum):
    """Largest tile <= target that divides dim; dim is a multiple of quantum."""
    t = min(dim, max(target, quantum))
    t -= t % quantum
    while dim % t:
        t -= quantum
    return t


def _vmem_limit():
    """Generation-aware scoped-VMEM limit (headroom for double buffers)."""
    try:
        cap = int(pltpu.get_tpu_info().vmem_capacity_bytes)
    except Exception:
        cap = 128 * 1024 * 1024
    # v7x (64 MiB physical) -> 48 MiB; v5e/v6e (128 MiB) -> 96 MiB.
    return max(32 * 1024 * 1024, min(int(cap * 3 // 4), 100 * 1024 * 1024))


# --------------------------------------------------------------------------
# kernel 1 & 3: tiled GEMM + bias (parallel grid; weight streamed ONCE)
# --------------------------------------------------------------------------
def _matmul_bias_kernel(x_ref, w_ref, b_ref, o_ref):
    o_ref[...] = (jnp.dot(x_ref[...], w_ref[...],
                          preferred_element_type=jnp.float32)
                  + b_ref[...]).astype(o_ref.dtype)


def _matmul_bias(x, w, b, *, out_dtype=jnp.float32,
                 tm_target=1024, tn_target=512):
    """x:(M,K) bf16, w:(K,N) bf16, b:(1,N) f32 -> (M,N) out_dtype."""
    M, K = x.shape
    _, N = w.shape
    tm = _pick_tile(M, tm_target, 8)
    tn = _pick_tile(N, tn_target, 128)
    return pl.pallas_call(
        _matmul_bias_kernel,
        out_shape=jax.ShapeDtypeStruct((M, N), out_dtype),
        grid_spec=pltpu.PrefetchScalarGridSpec(
            num_scalar_prefetch=0,
            # N (weight) tile on the slow/outer axis: each W tile is read from
            # HBM exactly once; only the (smaller) activation tile is re-fetched.
            grid=(N // tn, M // tm),
            in_specs=[
                pl.BlockSpec((tm, K), lambda j, i: (i, 0)),   # activations (bf16)
                pl.BlockSpec((K, tn), lambda j, i: (0, j)),   # weight, streamed once
                pl.BlockSpec((1, tn), lambda j, i: (0, j)),   # bias (f32)
            ],
            out_specs=pl.BlockSpec((tm, tn), lambda j, i: (i, j)),
        ),
        compiler_params=pltpu.CompilerParams(
            dimension_semantics=("parallel", "parallel"),
            vmem_limit_bytes=_vmem_limit()),
    )(x, w, b)


# --------------------------------------------------------------------------
# kernel 2: serial LSTM recurrence (T-chunked, optional batch shard)
# --------------------------------------------------------------------------
def _lstm_recurrence_kernel(z_ref, whh_ref, hseq_ref, h_ref, c_ref):
    Hp = h_ref.shape[-1]
    tt = z_ref.shape[0]

    # New batch shard (or very first chunk) -> reset the carried state.
    @pl.when(pl.program_id(1) == 0)
    def _():
        h_ref[...] = jnp.zeros_like(h_ref)
        c_ref[...] = jnp.zeros_like(c_ref)

    def step(t, carry):
        h_prev = h_ref[...]                       # f32 state
        c_prev = c_ref[...]
        hb = h_prev.astype(jnp.bfloat16)          # bf16 MXU operand only
        z_t = z_ref[t]                            # (Bpc, 4Hp) f32, lane-aligned gates

        def gate(g):
            # Per-gate (Hp,Hp) matmul: peak live gate data ~Bpc*Hp, and each
            # gate is consumed (sigmoid/tanh on EUP) as soon as it is produced.
            return (z_t[:, g * Hp:(g + 1) * Hp]
                    + jnp.dot(hb, whh_ref[:, g * Hp:(g + 1) * Hp],
                              preferred_element_type=jnp.float32))

        i_g = jax.nn.sigmoid(gate(0))
        f_g = jax.nn.sigmoid(gate(1))
        c_new = f_g * c_prev + i_g * jnp.tanh(gate(2))
        h_new = jax.nn.sigmoid(gate(3)) * jnp.tanh(c_new)

        c_ref[...] = c_new
        h_ref[...] = h_new
        hseq_ref[t] = h_new.astype(hseq_ref.dtype)   # bf16 output
        return carry

    jax.lax.fori_loop(0, tt, step, 0)


def _lstm_recurrence(z, w_hh_bf16, *, n_bshard=1, tt_target=8):
    """z:(T,Bp,4Hp) f32, w_hh:(Hp,4Hp) bf16 -> h_seq (T,Bp,Hp) bf16."""
    T, Bp, G = z.shape
    Hp = G // 4
    Bpc = Bp // n_bshard
    tt = _pick_tile(T, tt_target, 1)
    return pl.pallas_call(
        _lstm_recurrence_kernel,
        out_shape=jax.ShapeDtypeStruct((T, Bp, Hp), jnp.bfloat16),
        grid_spec=pltpu.PrefetchScalarGridSpec(
            num_scalar_prefetch=0,
            grid=(n_bshard, T // tt),
            in_specs=[
                pl.BlockSpec((tt, Bpc, G), lambda b, t: (t, b, 0)),  # Z chunk
                pl.BlockSpec((Hp, G), lambda b, t: (0, 0)),          # W_hh^T (resident)
            ],
            out_specs=pl.BlockSpec((tt, Bpc, Hp), lambda b, t: (t, b, 0)),
            scratch_shapes=[
                pltpu.VMEM((Bpc, Hp), jnp.float32),   # h (per-core)
                pltpu.VMEM((Bpc, Hp), jnp.float32),   # c (per-core)
            ],
        ),
        compiler_params=pltpu.CompilerParams(
            dimension_semantics=("parallel", "arbitrary"),  # batch shards || , T serial
            vmem_limit_bytes=_vmem_limit()),
    )(z, w_hh_bf16)


# --------------------------------------------------------------------------
# wrapper: DecoderRNN.forward(features, captions)
# --------------------------------------------------------------------------
def decoder_rnn_forward(features, captions, params):
    """features : (B, E) f32, captions : (B, L) i32 -> logits (B, L, V) f32."""
    embed_w = params["embed_w"]      # (V, E)
    w_ih_t = params["w_ih_t"]        # (E, 4H)
    w_hh_t = params["w_hh_t"]        # (H, 4H)
    b_ih = params["b_ih"]            # (1, 4H)
    b_hh = params["b_hh"]            # (1, 4H)
    w_fc_t = params["w_fc_t"]        # (H, V)
    b_fc = params["b_fc"]            # (1, V)

    B, E = features.shape
    H = w_hh_t.shape[0]
    V = w_fc_t.shape[1]

    Bp = _round_up(B, 8)      # sublane-dense batch
    Hp = _round_up(H, 128)    # lane-aligned gate slices
    Vp = _round_up(V, 128)    # lane-dense vocab stores

    # Glue (plain JAX): embedding gather + concat with the image feature.
    caps = captions[:, :-1]                                        # (B, L-1)
    caps_emb = embed_w[caps]                                       # (B, L-1, E)
    inputs = jnp.concatenate([features[:, None, :], caps_emb], 1)  # (B, T, E)
    T = inputs.shape[1]

    x_tm = jnp.transpose(inputs, (1, 0, 2)).astype(jnp.float32)    # (T, B, E)
    x_tm = _pad_axis(x_tm, 1, Bp)                                  # (T, Bp, E)

    # Gate-aligned, lane-padded parameters; MXU operands cast to bf16
    # (f32 accumulation everywhere). Zero-padded -> padded lanes stay 0.
    w_ih_p = _pad_gates(w_ih_t, H, Hp).astype(jnp.bfloat16)              # (E,  4Hp)
    w_hh_p = _pad_gates(_pad_axis(w_hh_t, 0, Hp), H, Hp).astype(jnp.bfloat16)  # (Hp, 4Hp)
    b_gate = _pad_gates(b_ih + b_hh, H, Hp)                              # (1,  4Hp) f32, pre-summed
    w_fc_p = _pad_axis(_pad_axis(w_fc_t, 0, Hp), 1, Vp).astype(jnp.bfloat16)   # (Hp, Vp)
    b_fc_p = _pad_axis(b_fc, 1, Vp)                                      # (1,  Vp) f32

    # 1) Hoisted input projection: one dense GEMM over all T*Bp rows.
    x_bf = x_tm.reshape(T * Bp, E).astype(jnp.bfloat16)
    z = _matmul_bias(x_bf, w_ih_p, b_gate, out_dtype=jnp.float32)        # (T*Bp, 4Hp)
    z = z.reshape(T, Bp, 4 * Hp)

    # 2) Serial LSTM recurrence (T-chunked; 2 batch shards when Bp allows it
    #    so v7x's second TensorCore takes half the batch — no effect on v5e/v6e).
    n_bshard = 2 if Bp % 32 == 0 else 1
    h_seq = _lstm_recurrence(z, w_hh_p, n_bshard=n_bshard)               # (T, Bp, Hp) bf16

    # 3) Hoisted vocab projection: dense parallel GEMM, W_fc streamed once.
    logits = _matmul_bias(h_seq.reshape(T * Bp, Hp), w_fc_p, b_fc_p,
                          out_dtype=jnp.float32)
    logits = logits.reshape(T, Bp, Vp)[:, :B, :V]                        # strip padding

    return jnp.transpose(logits, (1, 0, 2))                              # (B, T, V)


def init_params(key, embed_size, hidden_size, vocab_size):
    """Deterministic synthetic parameters matching the nn.Module shapes."""
    k = jax.random.split(key, 6)
    E, H, V = embed_size, hidden_size, vocab_size
    stdv = 1.0 / jnp.sqrt(H)
    embed_w = jax.random.uniform(k[0], (V, E), jnp.float32, -0.1, 0.1)
    # PyTorch LSTM stores weight_ih_l0 (4H, E) / weight_hh_l0 (4H, H);
    # we keep them pre-transposed for the kernels (gate order i, f, g, o).
    w_ih_t = jax.random.uniform(k[1], (E, 4 * H), jnp.float32, -stdv, stdv)
    w_hh_t = jax.random.uniform(k[2], (H, 4 * H), jnp.float32, -stdv, stdv)
    b_ih = jax.random.uniform(k[3], (1, 4 * H), jnp.float32, -stdv, stdv)
    b_hh = jax.random.uniform(k[4], (1, 4 * H), jnp.float32, -stdv, stdv)
    w_fc_t = jax.random.uniform(k[5], (H, V), jnp.float32, -0.1, 0.1)
    b_fc = jnp.zeros((1, V), jnp.float32)
    return {"embed_w": embed_w, "w_ih_t": w_ih_t, "w_hh_t": w_hh_t,
            "b_ih": b_ih, "b_hh": b_hh, "w_fc_t": w_fc_t, "b_fc": b_fc}


if __name__ == "__main__":
    B, E, H, V, L = 2, 32, 32, 128, 8   # batch, embed, hidden, vocab, caption len

    key = jax.random.PRNGKey(0)
    kp, kf, kc = jax.random.split(key, 3)
    params = init_params(kp, E, H, V)

    features = jax.random.normal(kf, (B, E), jnp.float32)
    captions = jax.random.randint(kc, (B, L), 0, V, dtype=jnp.int32)

    out = decoder_rnn_forward(features, captions, params)
    jax.block_until_ready(out)
    assert out.shape == (B, L, V), out.shape
    print("KERNEL_OK")
</pallas_src>

<mosaic_0001>
module attributes {stable_mosaic.version = 11 : i64} {
  func.func @_matmul_bias_kernel(%arg0: i32, %arg1: i32, %arg2: memref<64x32xbf16, #tpu.memory_space<vmem>>, %arg3: memref<32x512xbf16, #tpu.memory_space<vmem>>, %arg4: memref<1x512xf32, #tpu.memory_space<vmem>>, %arg5: memref<64x512xf32, #tpu.memory_space<vmem>>) attributes {dimension_semantics = [#tpu.dimension_semantics<parallel>, #tpu.dimension_semantics<parallel>], iteration_bounds = array<i64: 1, 1>, scalar_prefetch = 0 : i64, scratch_operands = 0 : i64, tpu.core_type = #tpu.core_type<tc>, window_params = [{transform_indices = @transform_0, window_bounds = array<i64: 64, 32>}, {transform_indices = @transform_1, window_bounds = array<i64: 32, 512>}, {transform_indices = @transform_2, window_bounds = array<i64: 1, 512>}, {transform_indices = @transform_3, window_bounds = array<i64: 64, 512>}]} {
    %c0 = arith.constant 0 : index
    %c0_0 = arith.constant 0 : index
    %0 = vector.load %arg2[%c0, %c0_0] : memref<64x32xbf16, #tpu.memory_space<vmem>>, vector<64x32xbf16>
    %c0_1 = arith.constant 0 : index
    %c0_2 = arith.constant 0 : index
    %1 = vector.load %arg3[%c0_1, %c0_2] : memref<32x512xbf16, #tpu.memory_space<vmem>>, vector<32x512xbf16>
    %cst = arith.constant dense<0.000000e+00> : vector<64x512xf32>
    %2 = tpu.matmul %0, %1, %cst {dimension_numbers = #tpu.dot_dimension_numbers<[1], [0], [0], [1], [0, 0, 1, 1], [], []>} : vector<64x32xbf16>, vector<32x512xbf16>, vector<64x512xf32> -> vector<64x512xf32>
    %c0_3 = arith.constant 0 : index
    %c0_4 = arith.constant 0 : index
    %3 = vector.load %arg4[%c0_3, %c0_4] : memref<1x512xf32, #tpu.memory_space<vmem>>, vector<1x512xf32>
    %4 = vector.broadcast %3 : vector<1x512xf32> to vector<64x512xf32>
    %5 = arith.addf %2, %4 : vector<64x512xf32>
    %c0_5 = arith.constant 0 : index
    %c0_6 = arith.constant 0 : index
    %6 = vector.load %arg5[%c0_5, %c0_6] : memref<64x512xf32, #tpu.memory_space<vmem>>, vector<64x512xf32>
    tpu.vector_store %arg5[%c0_5, %c0_6], %5 {strides = array<i32>} : memref<64x512xf32, #tpu.memory_space<vmem>>, vector<64x512xf32>,
    return
  }
  func.func @transform_0(%arg0: i32, %arg1: i32) -> (i32, i32) {
    %c0_i32 = arith.constant 0 : i32
    %c0_i32_0 = arith.constant 0 : i32
    return %arg1, %c0_i32 : i32, i32
  }
  func.func @transform_1(%arg0: i32, %arg1: i32) -> (i32, i32) {
    %c0_i32 = arith.constant 0 : i32
    %c0_i32_0 = arith.constant 0 : i32
    return %c0_i32, %arg0 : i32, i32
  }
  func.func @transform_2(%arg0: i32, %arg1: i32) -> (i32, i32) {
    %c0_i32 = arith.constant 0 : i32
    %c0_i32_0 = arith.constant 0 : i32
    return %c0_i32, %arg0 : i32, i32
  }
  func.func @transform_3(%arg0: i32, %arg1: i32) -> (i32, i32) {
    %c0_i32 = arith.constant 0 : i32
    return %arg1, %arg0 : i32, i32
  }
}

</mosaic_0001>

<bundles_post_ra>
// kernel: tpu_custom_call.1
= control target key start
LH: loop header
LB: loop body
LE: loop exit
PB: predicated region body
PF: predicated region fallthrough
CT: control target
= control target key end

     0   :  { %8 = vsyncpa [#allocation3], 0  ;;  %s519_s0 = inlined_call_operand.vmem [shape: bf16[64,32], index: 0, kind: input, shape index: {}]   ;;  %s520_s1 = inlined_call_operand.hbm [shape: bf16[32,512], index: 1, kind: input, shape index: {}]   ;;  %s521_s2 = inlined_call_operand.vmem [shape: f32[1,512], index: 2, kind: input, shape index: {}]   ;;  %s522_s3 = inlined_call_operand.hbm [shape: f32[64,512], index: 3, kind: output, shape index: {}]  }
   0x1   :  { %9 = vsyncpa [#allocation4], 0  ;;  %s423_s12 = smov [#allocation2]  }
   0x2   :  { %s17_s13 = sshll.u32 %s423_s12, 4  ;;  %s18_s13 = int_to_ptr.vmem [resolvable:$true] %s17_s13 }
   0x3   :  { %s387_s14 = scalar_lea.vmem %s18_s13, 1024  ;;  %p392_p1 = scmp.lt.s32.totalorder %s18_s13, %s18_s13 }
   0x4   :  { %p388_p0 = scmp.ne.s32.totalorder %s18_s13, %s387_s14  ;;  %p393_p2 = scmp.lt.s32.totalorder %s387_s14, %s387_s14 }
   0x6   :  { %p394_p3 = por %p393_p2, %p392_p1 }
   0x8   :  { %p395_p4 = pnand %p394_p3, %p388_p0 }
   0xa   :  { %398 = shalt.err (!%p395_p4)
}
   0xb   :  { %s424_s15 = smov 256   ;;  %s425_s16 = smov 16  }
   0xc   :  { %23 = dma.hbm_to_vmem [thread:$0]  %s520_s1, 1024, %s18_s13, [#allocation3], %s424_s15, %s424_s15, %s425_s16  }
   0xd   :  { %419 = dma.done.wait [#allocation3], 1024  }
   0xe   :  { %420 = vsyncadd [#allocation3], 4294966272  ;;  %v426_v0 = vmov 0   ;;  %v363_v1 = vld [vmem:[#allocation2 + $0x24] ss:$16 sps:$4 sm:$0xff]   ;;  %vm128_vm0 = vcmask 261120   ;;  %v48_v13 = vlaneseq }
   0xf   :  { %173 = vmatprep.mubr.bf16.mxu0 %v426_v0  ;;  %246 = vmatprep.mubr.bf16.mxu1 %v426_v0  ;;  %v365_v2 = vld [vmem:[#allocation2 + $0x2c] ss:$16 sps:$4 sm:$0xff]   ;;  %v367_v3 = vld [vmem:[#allocation2 + $0x20] ss:$16 sps:$4 sm:$0xff]   ;;  %v368_v4 = vld [vmem:[#allocation2 + $0x28] ss:$16 sps:$4 sm:$0xff]  }
  0x10   :  { %153 = vmatprep.subr.bf16.mxu0 %v363_v1  ;;  %226 = vmatprep.subr.bf16.mxu1 %v365_v2  ;;  %v369_v5 = vld [vmem:[#allocation2 + $0x4] ss:$16 sps:$4 sm:$0xff]   ;;  %v371_v6 = vld [vmem:[#allocation2 + $0xc] ss:$16 sps:$4 sm:$0xff]   ;;  %v373_v7 = vld [vmem:[#allocation2] ss:$16 sps:$4 sm:$0xff]  }
  0x11   :  { %154 = vmatpush1.bf16.msra.mxu0 %v367_v3  ;;  %227 = vmatpush1.bf16.msra.mxu1 %v368_v4  ;;  %v374_v8 = vld [vmem:[#allocation2 + $0x8] ss:$16 sps:$4 sm:$0xff]   ;;  %v375_v9 = vld [vmem:[%s519_s0] sm:$0xff]   ;;  %v377_v11 = vld [vmem:[%s519_s0 + $0x10] sm:$0xff]   ;;  %v49_v14 = vshrl.u32 %v48_v13, 7 }
  0x12   :  { %155 = vmatprep.subr.bf16.mxu0 %v369_v5  ;;  %228 = vmatprep.subr.bf16.mxu1 %v371_v6  ;;  %v376_v10 = vld [vmem:[%s519_s0 + $0x8] sm:$0xff]   ;;  %v378_v12 = vld [vmem:[%s519_s0 + $0x18] sm:$0xff]   ;;  %v46_v17 = vld [vmem:[%s521_s2] sm:$0xf]  ;;  %s427_s0 = smov [#allocation5]  }
  0x13   :  { %v50_v15 = vsub.s32 0, %v49_v14  ;;  %v58_v16 = vsub.s32 2, %v49_v14  ;;  %v54_v18 = vsub.s32 1, %v49_v14  ;;  %v62_v19 = vsub.s32 3, %v49_v14  ;;  %s324_s2 = sshll.u32 %s427_s0, 4  ;;  %s325_s2 = int_to_ptr.vmem [resolvable:$true] %s324_s2 }
  0x14   :  { %s399_s28 = scalar_lea.vmem %s325_s2, 4096  ;;  %p404_p6 = scmp.lt.s32.totalorder %s325_s2, %s325_s2 }
  0x15   :  { %156 = vmatpush1.bf16.msra.mxu0 %v373_v7  ;;  %229 = vmatpush1.bf16.msra.mxu1 %v374_v8  ;;  %v476_v20 = vrot.slane %v46_v17, %v50_v15  ;;  %v478_v21 = vrot.slane %v46_v17, %v58_v16  ;;  %v480_v22 = vrot.slane %v46_v17, %v54_v18  ;;  %p400_p5 = scmp.ne.s32.totalorder %s325_s2, %s399_s28  ;;  %p405_p7 = scmp.lt.s32.totalorder %s399_s28, %s399_s28 }
  0x16   :  { %v482_v23 = vrot.slane %v46_v17, %v62_v19 }
  0x17   :  { %p406_p8 = por %p405_p7, %p404_p6 }
  0x18   :  { %348 = vmatmul.mubr.msk.bf16.vlgmr.msra.gmra.mxu0 %vm128_vm0, %v375_v9  ;;  %352 = vmatmul.mubr.msk.bf16.vlgmr.msra.gmra.mxu1 %vm128_vm0, %v375_v9 }
  0x19   :  { %183 = vmatprep.mubr.bf16.mxu0 %v426_v0  ;;  %256 = vmatprep.mubr.bf16.mxu1 %v426_v0  ;;  %p407_p9 = pnand %p406_p8, %p400_p5 }
  0x20   :  { %349 = vmatmul.mubr.msk.bf16.gmra.mxu0 %vm128_vm0, %v376_v10  ;;  %353 = vmatmul.mubr.msk.bf16.gmra.mxu1 %vm128_vm0, %v376_v10 }
  0x21   :  { %193 = vmatprep.mubr.bf16.mxu0 %v426_v0  ;;  %266 = vmatprep.mubr.bf16.mxu1 %v426_v0 }
  0x28   :  { %350 = vmatmul.mubr.msk.bf16.gmra.mxu0 %vm128_vm0, %v377_v11  ;;  %354 = vmatmul.mubr.msk.bf16.gmra.mxu1 %vm128_vm0, %v377_v11 }
  0x29   :  { %203 = vmatprep.mubr.bf16.mxu0 %v426_v0  ;;  %276 = vmatprep.mubr.bf16.mxu1 %v426_v0 }
  0x30   :  { %351 = vmatmul.mubr.msk.bf16.gmra.mxu0 %vm128_vm0, %v378_v12  ;;  %355 = vmatmul.mubr.msk.bf16.gmra.mxu1 %vm128_vm0, %v378_v12 }
  0xd8   :  { %v175_v24 = vpop.f32.mrf.mxu0  ;;  %v248_v25 = vpop.f32.mrf.mxu1 }
  0xd9   :  { %v176_v26 = vadd.f32 %v175_v24, %v476_v20  ;;  %v249_v27 = vadd.f32 %v248_v25, %v478_v21 }
  0xda   :  { %v177_v28 = vpop.f32.mrf.mxu0  ;;  %v250_v29 = vpop.f32.mrf.mxu1 }
  0xdb   :  { %287 = vst [vmem:[#allocation5] sm:$0xff] %v176_v26  ;;  %289 = vst [vmem:[#allocation5 + $0x10] sm:$0xff] %v249_v27  ;;  %v178_v30 = vadd.f32 %v177_v28, %v480_v22  ;;  %v251_v31 = vadd.f32 %v250_v29, %v482_v23 }
  0xdc   :  { %v179_v32 = vpop.f32.mrf.mxu0  ;;  %v252_v33 = vpop.f32.mrf.mxu1 }
  0xdd   :  { %288 = vst [vmem:[#allocation5 + $0x8] sm:$0xff] %v178_v30  ;;  %290 = vst [vmem:[#allocation5 + $0x18] sm:$0xff] %v251_v31  ;;  %v180_v34 = vadd.f32 %v179_v32, %v476_v20  ;;  %v253_v35 = vadd.f32 %v252_v33, %v478_v21 }
  0xde   :  { %v181_v36 = vpop.f32.mrf.mxu0  ;;  %v254_v37 = vpop.f32.mrf.mxu1 }
  0xdf   :  { %291 = vst [vmem:[#allocation5 + $0x20] sm:$0xff] %v180_v34  ;;  %293 = vst [vmem:[#allocation5 + $0x30] sm:$0xff] %v253_v35  ;;  %v182_v38 = vadd.f32 %v181_v36, %v480_v22  ;;  %v255_v39 = vadd.f32 %v254_v37, %v482_v23 }
  0xe0   :  { %v185_v40 = vpop.f32.mrf.mxu0  ;;  %v258_v41 = vpop.f32.mrf.mxu1 }
  0xe1   :  { %292 = vst [vmem:[#allocation5 + $0x28] sm:$0xff] %v182_v38  ;;  %294 = vst [vmem:[#allocation5 + $0x38] sm:$0xff] %v255_v39  ;;  %v186_v42 = vadd.f32 %v185_v40, %v476_v20  ;;  %v259_v43 = vadd.f32 %v258_v41, %v478_v21 }
  0xe2   :  { %v187_v44 = vpop.f32.mrf.mxu0  ;;  %v260_v45 = vpop.f32.mrf.mxu1 }
  0xe3   :  { %295 = vst [vmem:[#allocation5 + $0x40] sm:$0xff] %v186_v42  ;;  %297 = vst [vmem:[#allocation5 + $0x50] sm:$0xff] %v259_v43  ;;  %v188_v46 = vadd.f32 %v187_v44, %v480_v22  ;;  %v261_v47 = vadd.f32 %v260_v45, %v482_v23 }
  0xe4   :  { %v189_v48 = vpop.f32.mrf.mxu0  ;;  %v262_v49 = vpop.f32.mrf.mxu1 }
  0xe5   :  { %296 = vst [vmem:[#allocation5 + $0x48] sm:$0xff] %v188_v46  ;;  %298 = vst [vmem:[#allocation5 + $0x58] sm:$0xff] %v261_v47  ;;  %v190_v50 = vadd.f32 %v189_v48, %v476_v20  ;;  %v263_v51 = vadd.f32 %v262_v49, %v478_v21 }
  0xe6   :  { %v191_v52 = vpop.f32.mrf.mxu0  ;;  %v264_v53 = vpop.f32.mrf.mxu1 }
  0xe7   :  { %299 = vst [vmem:[#allocation5 + $0x60] sm:$0xff] %v190_v50  ;;  %301 = vst [vmem:[#allocation5 + $0x70] sm:$0xff] %v263_v51  ;;  %v192_v54 = vadd.f32 %v191_v52, %v480_v22  ;;  %v265_v55 = vadd.f32 %v264_v53, %v482_v23 }
  0xe8   :  { %v195_v56 = vpop.f32.mrf.mxu0  ;;  %v268_v57 = vpop.f32.mrf.mxu1 }
  0xe9   :  { %300 = vst [vmem:[#allocation5 + $0x68] sm:$0xff] %v192_v54  ;;  %302 = vst [vmem:[#allocation5 + $0x78] sm:$0xff] %v265_v55  ;;  %v196_v58 = vadd.f32 %v195_v56, %v476_v20  ;;  %v269_v59 = vadd.f32 %v268_v57, %v478_v21 }
  0xea   :  { %v197_v60 = vpop.f32.mrf.mxu0  ;;  %v270_v61 = vpop.f32.mrf.mxu1 }
  0xeb   :  { %303 = vst [vmem:[#allocation5 + $0x80] sm:$0xff] %v196_v58  ;;  %305 = vst [vmem:[#allocation5 + $0x90] sm:$0xff] %v269_v59  ;;  %v198_v62 = vadd.f32 %v197_v60, %v480_v22  ;;  %v271_v63 = vadd.f32 %v270_v61, %v482_v23 }
  0xec   :  { %v199_v0 = vpop.f32.mrf.mxu0  ;;  %v272_v1 = vpop.f32.mrf.mxu1 }
  0xed   :  { %304 = vst [vmem:[#allocation5 + $0x88] sm:$0xff] %v198_v62  ;;  %306 = vst [vmem:[#allocation5 + $0x98] sm:$0xff] %v271_v63  ;;  %v200_v2 = vadd.f32 %v199_v0, %v476_v20  ;;  %v273_v3 = vadd.f32 %v272_v1, %v478_v21 }
  0xee   :  { %v201_v4 = vpop.f32.mrf.mxu0  ;;  %v274_v5 = vpop.f32.mrf.mxu1 }
  0xef   :  { %307 = vst [vmem:[#allocation5 + $0xa0] sm:$0xff] %v200_v2  ;;  %309 = vst [vmem:[#allocation5 + $0xb0] sm:$0xff] %v273_v3  ;;  %v202_v6 = vadd.f32 %v201_v4, %v480_v22  ;;  %v275_v7 = vadd.f32 %v274_v5, %v482_v23 }
  0xf0   :  { %v205_v8 = vpop.f32.mrf.mxu0  ;;  %v278_v9 = vpop.f32.mrf.mxu1 }
  0xf1   :  { %308 = vst [vmem:[#allocation5 + $0xa8] sm:$0xff] %v202_v6  ;;  %310 = vst [vmem:[#allocation5 + $0xb8] sm:$0xff] %v275_v7  ;;  %v206_v10 = vadd.f32 %v205_v8, %v476_v20  ;;  %v279_v11 = vadd.f32 %v278_v9, %v478_v21 }
  0xf2   :  { %v207_v12 = vpop.f32.mrf.mxu0  ;;  %v280_v13 = vpop.f32.mrf.mxu1 }
  0xf3   :  { %311 = vst [vmem:[#allocation5 + $0xc0] sm:$0xff] %v206_v10  ;;  %313 = vst [vmem:[#allocation5 + $0xd0] sm:$0xff] %v279_v11  ;;  %v208_v14 = vadd.f32 %v207_v12, %v480_v22  ;;  %v281_v15 = vadd.f32 %v280_v13, %v482_v23 }
  0xf4   :  { %v209_v16 = vpop.f32.mrf.mxu0  ;;  %v282_v17 = vpop.f32.mrf.mxu1 }
  0xf5   :  { %312 = vst [vmem:[#allocation5 + $0xc8] sm:$0xff] %v208_v14  ;;  %314 = vst [vmem:[#allocation5 + $0xd8] sm:$0xff] %v281_v15  ;;  %v210_v18 = vadd.f32 %v209_v16, %v476_v20  ;;  %v283_v19 = vadd.f32 %v282_v17, %v478_v21 }
  0xf6   :  { %v211_v24 = vpop.f32.mrf.mxu0  ;;  %v284_v25 = vpop.f32.mrf.mxu1 }
  0xf7   :  { %315 = vst [vmem:[#allocation5 + $0xe0] sm:$0xff] %v210_v18  ;;  %317 = vst [vmem:[#allocation5 + $0xf0] sm:$0xff] %v283_v19  ;;  %v212_v26 = vadd.f32 %v211_v24, %v480_v22  ;;  %v285_v27 = vadd.f32 %v284_v25, %v482_v23 }
  0xf9   :  { %316 = vst [vmem:[#allocation5 + $0xe8] sm:$0xff] %v212_v26  ;;  %318 = vst [vmem:[#allocation5 + $0xf8] sm:$0xff] %v285_v27 }
  0xfa   :  { %410 = shalt.err (!%p407_p9)
}
  0xfb   :  { %s428_s29 = smov 512   ;;  %s429_s30 = smov 32  }
  0xfc   :  { %330 = dma.vmem_to_hbm [thread:$0]  %s325_s2, 4096, %s522_s3, [#allocation4], %s428_s29, %s428_s29, %s429_s30  }
  0xfd   :  { %421 = dma.done.wait [#allocation4], 4096  }
  0xfe   :  { %422 = vsyncadd [#allocation4], 4294963200 }
  0xff   :  { %334 = vsyncpa [#allocation3], 1 }
 0x100   :  { %335 = vsyncpa [#allocation4], 1 }

</bundles_post_ra>
